<compile_context>
chip_gen: v6e
topology: v6e:2x2x1
jax: 0.10.0
libtpu: 0.0.40
codegen_flags: <defaults>
</compile_context>

<pallas_src>
import math
import numpy as np
import jax
import jax.numpy as jnp
from jax import lax
from jax.experimental import pallas as pl
from jax.experimental.pallas import tpu as pltpu

# --- config (small, consistent with the module) ---
B, T, C, H = 2, 8, 32, 4          # batch, seq_len, n_embd, n_head
HD = C // H                        # head_dim = 8
N = B * T                          # flattened rows handled in one invocation
EPS = 1e-5                         # nn.LayerNorm default
SCALE = 1.0 / math.sqrt(HD)
assert C % H == 0 and N <= C       # mask is lane-padded into a C-wide table

# row layout of the packed per-row tables (shape (3N, C)):
ROW_COS, ROW_SIN, ROW_MASK = 0, N, 2 * N

# lane layout of the packed weights (shape (C, 21C)); every big matmul RHS
# window starts on a 128-lane boundary:
OFF_W12 = 0              # [W1|W2]           width 8C  (lanes   0..256)
OFF_WC = 8 * C           # Wc^T (C,4C)       width 4C  (lanes 256..384)
OFF_ATT = 12 * C         # [Wq|Wk|Wv|Wqs|Wks] width 5C (lanes 384..544), then 3C pad
OFF_PROJ = 20 * C        # Wproj             width  C  (lanes 640..672)
W_PACK_COLS = 21 * C


def _layernorm(h):
    # gamma/beta are folded into the following projection weights at pack time
    mu = jnp.mean(h, axis=-1, keepdims=True)
    var = jnp.mean(jnp.square(h - mu), axis=-1, keepdims=True)
    return (h - mu) * lax.rsqrt(var + EPS)


def block_kernel(x_ref, tab_ref, bias_ref, w_ref, out_ref, y_ref):
    f32 = jnp.float32
    x = x_ref[...]                                      # (N, C)

    cos = tab_ref[ROW_COS:ROW_COS + N, :]               # (N, C)
    sin = tab_ref[ROW_SIN:ROW_SIN + N, :]               # (N, C)
    mask = tab_ref[ROW_MASK:ROW_MASK + N, 0:N]          # (N, N) additive 0/-1e30

    b12 = bias_ref[0:1, :]                              # (1, 8C)
    b_att = bias_ref[1:2, 0:5 * C]                      # (1, 5C)
    bproj = bias_ref[2:3, 0:C]                          # (1, C)
    bc = bias_ref[3:4, 0:C]                             # (1, C)

    # ---------- attention branch ----------
    h = _layernorm(x)
    # single fused MXU push: q, k, v and the rotary swap-companions of q and k
    qkvs = jnp.dot(h, w_ref[:, OFF_ATT:OFF_ATT + 5 * C],
                   preferred_element_type=f32) + b_att           # (N, 5C)
    # rotary: companion columns (pair-swap, sign, gamma, 1/sqrt(hd)) pre-folded
    q = qkvs[:, 0:C] * cos + qkvs[:, 3 * C:4 * C] * sin          # (N, C)
    k = qkvs[:, C:2 * C] * cos + qkvs[:, 4 * C:5 * C] * sin
    v = qkvs[:, 2 * C:3 * C]

    # TODO(synk): batch these H tiny matmuls block-diagonally for prod shapes.
    for hh in range(H):                                 # static unroll over heads
        s0 = hh * HD
        qh = q[:, s0:s0 + HD]
        kh = k[:, s0:s0 + HD]
        vh = v[:, s0:s0 + HD]
        # q @ k^T without materializing kh.T (contracting dims (1,1))
        s = lax.dot_general(qh, kh, (((1,), (1,)), ((), ())),
                            preferred_element_type=f32) + mask
        e = jnp.exp(s - jnp.max(s, axis=-1, keepdims=True))
        p = e * pl.reciprocal(jnp.sum(e, axis=-1, keepdims=True), approx=True)
        y_ref[:, s0:s0 + HD] = jnp.dot(p, vh, preferred_element_type=f32)

    # single output projection over the concatenated heads in the scratch
    x1 = x + jnp.dot(y_ref[...], w_ref[:, OFF_PROJ:OFF_PROJ + C],
                     preferred_element_type=f32) + bproj

    # ---------- FFN branch: lin1(h) * SiLU(lin2(h)) -> c_proj ----------
    h2 = _layernorm(x1)
    ag = jnp.dot(h2, w_ref[:, OFF_W12:OFF_W12 + 8 * C],
                 preferred_element_type=f32) + b12               # fused [W1|W2]
    a = ag[:, 0:4 * C]
    g = ag[:, 4 * C:8 * C]
    g = g * (0.5 * jnp.tanh(0.5 * g) + 0.5)                      # SiLU, one EUP tanh
    ff = lax.dot_general(a * g, w_ref[:, OFF_WC:OFF_WC + 4 * C],
                         (((1,), (1,)), ((), ())),
                         preferred_element_type=f32) + bc        # Wc stored transposed
    out_ref[...] = x1 + ff


def pack_inputs(p):
    """Fold LN affine / attention scale / rotary swap into a few packed arrays."""
    f32 = jnp.float32
    wq, wk, wv = jnp.split(p["wqkv"], 3, axis=1)       # (C, C) each
    bq, bk, bv = jnp.split(p["bqkv"], 3, axis=1)       # (1, C) each

    # LN(x) @ W + b == ((x-mu)*rsqrt(var)) @ (diag(g) W) + (beta @ W + b)
    def fold_ln(g, beta, w, b):
        return w * g.reshape(-1, 1), beta @ w + b

    wq_e, bq_e = fold_ln(p["ln1g"][0], p["ln1b"], wq, bq)
    wk_e, bk_e = fold_ln(p["ln1g"][0], p["ln1b"], wk, bk)
    wv_e, bv_e = fold_ln(p["ln1g"][0], p["ln1b"], wv, bv)
    w1_e, b1_e = fold_ln(p["ln2g"][0], p["ln2b"], p["w1"], p["b1"])
    w2_e, b2_e = fold_ln(p["ln2g"][0], p["ln2b"], p["w2"], p["b2"])

    # fold 1/sqrt(head_dim) into the q projection (free, exact up to rounding)
    wq_e, bq_e = wq_e * SCALE, bq_e * SCALE

    # rotary companion: comp(q)[2i] = -q[2i+1], comp(q)[2i+1] = q[2i]
    #                   == h @ swap_cols(Wq) + swap_cols(bq)
    def swap_cols(w):
        wr = w.reshape(w.shape[0], C // 2, 2)
        return jnp.stack([-wr[..., 1], wr[..., 0]], axis=-1).reshape(w.shape[0], C)

    wqs, bqs = swap_cols(wq_e), swap_cols(bq_e)
    wks, bks = swap_cols(wk_e), swap_cols(bk_e)

    w_att = jnp.concatenate([wq_e, wk_e, wv_e, wqs, wks], axis=1)    # (C, 5C)
    b_att = jnp.concatenate([bq_e, bk_e, bv_e, bqs, bks], axis=1)    # (1, 5C)
    w12 = jnp.concatenate([w1_e, w2_e], axis=1)                       # (C, 8C)
    b12 = jnp.concatenate([b1_e, b2_e], axis=1)                       # (1, 8C)
    wcT = p["wc"].T                                                   # (C, 4C)

    pad = jnp.zeros((C, 3 * C), f32)
    w_pack = jnp.concatenate([w12, wcT, w_att, pad, p["wproj"]], axis=1)  # (C, 21C)
    assert w_pack.shape == (C, W_PACK_COLS)

    def pad_to(v, width):
        return jnp.concatenate(
            [v, jnp.zeros((v.shape[0], width - v.shape[1]), f32)], axis=1)

    bias_pack = jnp.concatenate(
        [b12, pad_to(b_att, 8 * C), pad_to(p["bproj"], 8 * C),
         pad_to(p["bc"], 8 * C)], axis=0)                             # (4, 8C)

    # per-row tables: rotary cos/sin per flattened row + additive causal mask
    cos_flat = jnp.tile(p["cos"], (B, 1))                             # (N, C)
    sin_flat = jnp.tile(p["sin"], (B, 1))
    r = np.arange(N)
    allowed = (r[:, None] // T == r[None, :] // T) & (r[:, None] >= r[None, :])
    mask_bias = np.where(allowed, 0.0, -1e30).astype(np.float32)      # (N, N)
    mask_pad = jnp.asarray(np.pad(mask_bias, ((0, 0), (0, C - N))))   # (N, C)
    tab_pack = jnp.concatenate([cos_flat, sin_flat, mask_pad], axis=0)  # (3N, C)
    return tab_pack, bias_pack, w_pack


def block_forward(x, params):
    tab_pack, bias_pack, w_pack = pack_inputs(params)
    x_flat = x.reshape(N, C)

    def full(shape):
        return pl.BlockSpec(shape, lambda i: (0, 0))

    out_flat = pl.pallas_call(
        block_kernel,
        out_shape=jax.ShapeDtypeStruct((N, C), jnp.float32),
        grid=(1,),                     # whole (flattened) problem in one step
        in_specs=[full(x_flat.shape), full(tab_pack.shape),
                  full(bias_pack.shape), full(w_pack.shape)],
        out_specs=pl.BlockSpec((N, C), lambda i: (0, 0)),
        scratch_shapes=[pltpu.VMEM((N, C), jnp.float32)],   # concat-of-heads buffer
        compiler_params=pltpu.CompilerParams(dimension_semantics=("arbitrary",)),
    )(x_flat, tab_pack, bias_pack, w_pack)
    return out_flat.reshape(B, T, C)


def make_params(key):
    ks = jax.random.split(key, 10)
    s = 0.02
    p = {
        "ln1g": jnp.ones((1, C), jnp.float32),
        "ln1b": jnp.zeros((1, C), jnp.float32),
        "ln2g": jnp.ones((1, C), jnp.float32),
        "ln2b": jnp.zeros((1, C), jnp.float32),
        "wqkv": s * jax.random.normal(ks[0], (C, 3 * C), jnp.float32),  # (in,out) [q|k|v]
        "bqkv": s * jax.random.normal(ks[1], (1, 3 * C), jnp.float32),
        "wproj": s * jax.random.normal(ks[2], (C, C), jnp.float32),
        "bproj": s * jax.random.normal(ks[3], (1, C), jnp.float32),
        "w1": s * jax.random.normal(ks[4], (C, 4 * C), jnp.float32),
        "b1": s * jax.random.normal(ks[5], (1, 4 * C), jnp.float32),
        "w2": s * jax.random.normal(ks[6], (C, 4 * C), jnp.float32),
        "b2": s * jax.random.normal(ks[7], (1, 4 * C), jnp.float32),
        "wc": s * jax.random.normal(ks[8], (4 * C, C), jnp.float32),
        "bc": s * jax.random.normal(ks[9], (1, C), jnp.float32),
    }
    # rotary tables (RotaryPosEmbed): angles[t, i] = t * 10000^(-2i/HD)
    idx = jnp.arange(0, HD, 2, dtype=jnp.float32)
    theta = 10000.0 ** (-idx / HD)
    pos = jnp.arange(T, dtype=jnp.float32)
    angles = pos[:, None] * theta[None, :]                  # (T, HD//2)
    cos_full = jnp.repeat(jnp.cos(angles), 2, axis=-1)      # (T, HD): c0,c0,c1,c1,...
    sin_full = jnp.repeat(jnp.sin(angles), 2, axis=-1)
    p["cos"] = jnp.tile(cos_full, (1, H))                   # (T, C), repeated per head
    p["sin"] = jnp.tile(sin_full, (1, H))
    p["angles"] = angles
    return p


def reference(x, p):
    """Pure-JAX reference mirroring the PyTorch module semantics."""
    def ln(h, g, b):
        mu = jnp.mean(h, -1, keepdims=True)
        var = jnp.mean((h - mu) ** 2, -1, keepdims=True)
        return (h - mu) / jnp.sqrt(var + EPS) * g + b

    h = ln(x, p["ln1g"], p["ln1b"])
    qkv = h @ p["wqkv"] + p["bqkv"]
    q, k, v = jnp.split(qkv, 3, axis=-1)

    def rot(z):
        zr = z.reshape(B, T, H, HD)
        z1, z2 = zr[..., 0::2], zr[..., 1::2]
        c = jnp.cos(p["angles"])[None, :, None, :]
        s = jnp.sin(p["angles"])[None, :, None, :]
        z1r = z1 * c - z2 * s
        z2r = z1 * s + z2 * c
        return jnp.stack([z1r, z2r], -1).reshape(B, T, H, HD)

    qh = rot(q).transpose(0, 2, 1, 3)          # (B, H, T, HD)
    kh = rot(k).transpose(0, 2, 1, 3)
    vh = v.reshape(B, T, H, HD).transpose(0, 2, 1, 3)
    s = jnp.einsum("bhqd,bhkd->bhqk", qh, kh) / math.sqrt(HD)
    mask = jnp.tril(jnp.ones((T, T), bool))
    s = jnp.where(mask, s, -jnp.inf)
    pm = jax.nn.softmax(s, axis=-1)
    y = jnp.einsum("bhqk,bhkd->bhqd", pm, vh).transpose(0, 2, 1, 3).reshape(B, T, C)
    x1 = x + (y @ p["wproj"] + p["bproj"])

    h2 = ln(x1, p["ln2g"], p["ln2b"])
    a = h2 @ p["w1"] + p["b1"]
    g = h2 @ p["w2"] + p["b2"]
    ff = (a * jax.nn.silu(g)) @ p["wc"] + p["bc"]
    return x1 + ff


if __name__ == "__main__":
    key = jax.random.PRNGKey(0)
    kx, kp = jax.random.split(key)
    x = jax.random.normal(kx, (B, T, C), jnp.float32)
    params = make_params(kp)

    out = jax.block_until_ready(block_forward(x, params))
    ref = reference(x, params)

    assert out.shape == (B, T, C)
    err = float(jnp.max(jnp.abs(out - ref)))
    assert np.allclose(np.asarray(out), np.asarray(ref), atol=3e-4, rtol=3e-4), \
        f"Pallas output does not match reference (max abs err = {err})"
    print("KERNEL_OK")
</pallas_src>

<mosaic_0001>
module attributes {stable_mosaic.version = 11 : i64} {
  func.func @block_kernel(%arg0: i32, %arg1: memref<16x32xf32, #tpu.memory_space<vmem>>, %arg2: memref<48x32xf32, #tpu.memory_space<vmem>>, %arg3: memref<4x256xf32, #tpu.memory_space<vmem>>, %arg4: memref<32x672xf32, #tpu.memory_space<vmem>>, %arg5: memref<16x32xf32, #tpu.memory_space<vmem>>, %arg6: memref<16x32xf32, #tpu.memory_space<vmem>>) attributes {dimension_semantics = [#tpu.dimension_semantics<arbitrary>], iteration_bounds = array<i64: 1>, scalar_prefetch = 0 : i64, scratch_operands = 1 : i64, tpu.core_type = #tpu.core_type<tc>, window_params = [{pipeline_mode = #tpu.pipeline_mode<synchronous>, transform_indices = @transform_0, window_bounds = array<i64: 16, 32>}, {pipeline_mode = #tpu.pipeline_mode<synchronous>, transform_indices = @transform_1, window_bounds = array<i64: 48, 32>}, {pipeline_mode = #tpu.pipeline_mode<synchronous>, transform_indices = @transform_2, window_bounds = array<i64: 4, 256>}, {pipeline_mode = #tpu.pipeline_mode<synchronous>, transform_indices = @transform_3, window_bounds = array<i64: 32, 672>}, {pipeline_mode = #tpu.pipeline_mode<synchronous>, transform_indices = @transform_4, window_bounds = array<i64: 16, 32>}]} {
    %c0 = arith.constant 0 : index
    %c0_0 = arith.constant 0 : index
    %0 = vector.load %arg1[%c0, %c0_0] : memref<16x32xf32, #tpu.memory_space<vmem>>, vector<16x32xf32>
    %c0_1 = arith.constant 0 : index
    %c0_2 = arith.constant 0 : index
    %1 = vector.load %arg2[%c0_1, %c0_2] : memref<48x32xf32, #tpu.memory_space<vmem>>, vector<16x32xf32>
    %c16 = arith.constant 16 : index
    %c0_3 = arith.constant 0 : index
    %2 = vector.load %arg2[%c16, %c0_3] : memref<48x32xf32, #tpu.memory_space<vmem>>, vector<16x32xf32>
    %c32 = arith.constant 32 : index
    %c0_4 = arith.constant 0 : index
    %3 = vector.load %arg2[%c32, %c0_4] : memref<48x32xf32, #tpu.memory_space<vmem>>, vector<16x16xf32>
    %c0_5 = arith.constant 0 : index
    %c0_6 = arith.constant 0 : index
    %4 = vector.load %arg3[%c0_5, %c0_6] : memref<4x256xf32, #tpu.memory_space<vmem>>, vector<1x256xf32>
    %c1 = arith.constant 1 : index
    %c0_7 = arith.constant 0 : index
    %5 = vector.load %arg3[%c1, %c0_7] : memref<4x256xf32, #tpu.memory_space<vmem>>, vector<1x160xf32>
    %c2 = arith.constant 2 : index
    %c0_8 = arith.constant 0 : index
    %6 = vector.load %arg3[%c2, %c0_8] : memref<4x256xf32, #tpu.memory_space<vmem>>, vector<1x32xf32>
    %c3 = arith.constant 3 : index
    %c0_9 = arith.constant 0 : index
    %7 = vector.load %arg3[%c3, %c0_9] : memref<4x256xf32, #tpu.memory_space<vmem>>, vector<1x32xf32>
    %cst = arith.constant dense<0.000000e+00> : vector<16xf32>
    %8 = vector.multi_reduction <add>, %0, %cst [1] : vector<16x32xf32> to vector<16xf32>
    %9 = vector.shape_cast %8 : vector<16xf32> to vector<16x1xf32>
    %cst_10 = arith.constant 3.200000e+01 : f32
    %10 = vector.broadcast %cst_10 : f32 to vector<16x1xf32>
    %11 = arith.divf %9, %10 : vector<16x1xf32>
    %12 = vector.broadcast %11 : vector<16x1xf32> to vector<16x32xf32>
    %13 = arith.subf %0, %12 : vector<16x32xf32>
    %14 = arith.mulf %13, %13 : vector<16x32xf32>
    %cst_11 = arith.constant dense<0.000000e+00> : vector<16xf32>
    %15 = vector.multi_reduction <add>, %14, %cst_11 [1] : vector<16x32xf32> to vector<16xf32>
    %16 = vector.shape_cast %15 : vector<16xf32> to vector<16x1xf32>
    %cst_12 = arith.constant 3.200000e+01 : f32
    %17 = vector.broadcast %cst_12 : f32 to vector<16x1xf32>
    %18 = arith.divf %16, %17 : vector<16x1xf32>
    %19 = vector.broadcast %11 : vector<16x1xf32> to vector<16x32xf32>
    %20 = arith.subf %0, %19 : vector<16x32xf32>
    %cst_13 = arith.constant 9.99999974E-6 : f32
    %21 = vector.broadcast %cst_13 : f32 to vector<16x1xf32>
    %22 = arith.addf %18, %21 : vector<16x1xf32>
    %23 = math.rsqrt %22 : vector<16x1xf32>
    %24 = vector.broadcast %23 : vector<16x1xf32> to vector<16x32xf32>
    %25 = arith.mulf %20, %24 : vector<16x32xf32>
    %c0_14 = arith.constant 0 : index
    %c384 = arith.constant 384 : index
    %26 = vector.load %arg4[%c0_14, %c384] : memref<32x672xf32, #tpu.memory_space<vmem>>, vector<32x160xf32>
    %cst_15 = arith.constant dense<0.000000e+00> : vector<16x160xf32>
    %27 = tpu.matmul %25, %26, %cst_15 {dimension_numbers = #tpu.dot_dimension_numbers<[1], [0], [0], [1], [0, 0, 1, 1], [], []>} : vector<16x32xf32>, vector<32x160xf32>, vector<16x160xf32> -> vector<16x160xf32>
    %28 = vector.broadcast %5 : vector<1x160xf32> to vector<16x160xf32>
    %29 = arith.addf %27, %28 : vector<16x160xf32>
    %30 = vector.extract_strided_slice %29 {offsets = [0, 0], sizes = [16, 32], strides = [1, 1]} : vector<16x160xf32> to vector<16x32xf32>
    %31 = arith.mulf %30, %1 : vector<16x32xf32>
    %32 = vector.extract_strided_slice %29 {offsets = [0, 96], sizes = [16, 32], strides = [1, 1]} : vector<16x160xf32> to vector<16x32xf32>
    %33 = arith.mulf %32, %2 : vector<16x32xf32>
    %34 = arith.addf %31, %33 : vector<16x32xf32>
    %35 = vector.extract_strided_slice %29 {offsets = [0, 32], sizes = [16, 32], strides = [1, 1]} : vector<16x160xf32> to vector<16x32xf32>
    %36 = arith.mulf %35, %1 : vector<16x32xf32>
    %37 = vector.extract_strided_slice %29 {offsets = [0, 128], sizes = [16, 32], strides = [1, 1]} : vector<16x160xf32> to vector<16x32xf32>
    %38 = arith.mulf %37, %2 : vector<16x32xf32>
    %39 = arith.addf %36, %38 : vector<16x32xf32>
    %40 = vector.extract_strided_slice %29 {offsets = [0, 64], sizes = [16, 32], strides = [1, 1]} : vector<16x160xf32> to vector<16x32xf32>
    %41 = vector.extract_strided_slice %34 {offsets = [0, 0], sizes = [16, 8], strides = [1, 1]} : vector<16x32xf32> to vector<16x8xf32>
    %42 = vector.extract_strided_slice %39 {offsets = [0, 0], sizes = [16, 8], strides = [1, 1]} : vector<16x32xf32> to vector<16x8xf32>
    %43 = vector.extract_strided_slice %40 {offsets = [0, 0], sizes = [16, 8], strides = [1, 1]} : vector<16x32xf32> to vector<16x8xf32>
    %cst_16 = arith.constant dense<0.000000e+00> : vector<16x16xf32>
    %44 = tpu.matmul %41, %42, %cst_16 {dimension_numbers = #tpu.dot_dimension_numbers<[1], [1], [0], [0], [0, 0, 1, 0], [], []>} : vector<16x8xf32>, vector<16x8xf32>, vector<16x16xf32> -> vector<16x16xf32>
    %45 = arith.addf %44, %3 : vector<16x16xf32>
    %cst_17 = arith.constant dense<0xFF800000> : vector<16xf32>
    %46 = vector.multi_reduction <maximumf>, %45, %cst_17 [1] : vector<16x16xf32> to vector<16xf32>
    %47 = vector.shape_cast %46 : vector<16xf32> to vector<16x1xf32>
    %48 = vector.broadcast %47 : vector<16x1xf32> to vector<16x16xf32>
    %49 = arith.subf %45, %48 : vector<16x16xf32>
    %50 = math.exp %49 : vector<16x16xf32>
    %cst_18 = arith.constant dense<0.000000e+00> : vector<16xf32>
    %51 = vector.multi_reduction <add>, %50, %cst_18 [1] : vector<16x16xf32> to vector<16xf32>
    %52 = vector.shape_cast %51 : vector<16xf32> to vector<16x1xf32>
    %53 = tpu.reciprocal %52 {approx = true} : vector<16x1xf32> -> vector<16x1xf32>
    %54 = vector.broadcast %53 : vector<16x1xf32> to vector<16x16xf32>
    %55 = arith.mulf %50, %54 : vector<16x16xf32>
    %cst_19 = arith.constant dense<0.000000e+00> : vector<16x8xf32>
    %56 = tpu.matmul %55, %43, %cst_19 {dimension_numbers = #tpu.dot_dimension_numbers<[1], [0], [0], [1], [0, 0, 1, 1], [], []>} : vector<16x16xf32>, vector<16x8xf32>, vector<16x8xf32> -> vector<16x8xf32>
    %c0_20 = arith.constant 0 : index
    %c0_21 = arith.constant 0 : index
    %57 = vector.load %arg6[%c0_20, %c0_21] : memref<16x32xf32, #tpu.memory_space<vmem>>, vector<16x8xf32>
    tpu.vector_store %arg6[%c0_20, %c0_21], %56 {strides = array<i32>} : memref<16x32xf32, #tpu.memory_space<vmem>>, vector<16x8xf32>,
    %58 = vector.extract_strided_slice %34 {offsets = [0, 8], sizes = [16, 8], strides = [1, 1]} : vector<16x32xf32> to vector<16x8xf32>
    %59 = vector.extract_strided_slice %39 {offsets = [0, 8], sizes = [16, 8], strides = [1, 1]} : vector<16x32xf32> to vector<16x8xf32>
    %60 = vector.extract_strided_slice %40 {offsets = [0, 8], sizes = [16, 8], strides = [1, 1]} : vector<16x32xf32> to vector<16x8xf32>
    %cst_22 = arith.constant dense<0.000000e+00> : vector<16x16xf32>
    %61 = tpu.matmul %58, %59, %cst_22 {dimension_numbers = #tpu.dot_dimension_numbers<[1], [1], [0], [0], [0, 0, 1, 0], [], []>} : vector<16x8xf32>, vector<16x8xf32>, vector<16x16xf32> -> vector<16x16xf32>
    %62 = arith.addf %61, %3 : vector<16x16xf32>
    %cst_23 = arith.constant dense<0xFF800000> : vector<16xf32>
    %63 = vector.multi_reduction <maximumf>, %62, %cst_23 [1] : vector<16x16xf32> to vector<16xf32>
    %64 = vector.shape_cast %63 : vector<16xf32> to vector<16x1xf32>
    %65 = vector.broadcast %64 : vector<16x1xf32> to vector<16x16xf32>
    %66 = arith.subf %62, %65 : vector<16x16xf32>
    %67 = math.exp %66 : vector<16x16xf32>
    %cst_24 = arith.constant dense<0.000000e+00> : vector<16xf32>
    %68 = vector.multi_reduction <add>, %67, %cst_24 [1] : vector<16x16xf32> to vector<16xf32>
    %69 = vector.shape_cast %68 : vector<16xf32> to vector<16x1xf32>
    %70 = tpu.reciprocal %69 {approx = true} : vector<16x1xf32> -> vector<16x1xf32>
    %71 = vector.broadcast %70 : vector<16x1xf32> to vector<16x16xf32>
    %72 = arith.mulf %67, %71 : vector<16x16xf32>
    %cst_25 = arith.constant dense<0.000000e+00> : vector<16x8xf32>
    %73 = tpu.matmul %72, %60, %cst_25 {dimension_numbers = #tpu.dot_dimension_numbers<[1], [0], [0], [1], [0, 0, 1, 1], [], []>} : vector<16x16xf32>, vector<16x8xf32>, vector<16x8xf32> -> vector<16x8xf32>
    %c0_26 = arith.constant 0 : index
    %c8 = arith.constant 8 : index
    %74 = vector.load %arg6[%c0_26, %c8] : memref<16x32xf32, #tpu.memory_space<vmem>>, vector<16x8xf32>
    tpu.vector_store %arg6[%c0_26, %c8], %73 {strides = array<i32>} : memref<16x32xf32, #tpu.memory_space<vmem>>, vector<16x8xf32>,
    %75 = vector.extract_strided_slice %34 {offsets = [0, 16], sizes = [16, 8], strides = [1, 1]} : vector<16x32xf32> to vector<16x8xf32>
    %76 = vector.extract_strided_slice %39 {offsets = [0, 16], sizes = [16, 8], strides = [1, 1]} : vector<16x32xf32> to vector<16x8xf32>
    %77 = vector.extract_strided_slice %40 {offsets = [0, 16], sizes = [16, 8], strides = [1, 1]} : vector<16x32xf32> to vector<16x8xf32>
    %cst_27 = arith.constant dense<0.000000e+00> : vector<16x16xf32>
    %78 = tpu.matmul %75, %76, %cst_27 {dimension_numbers = #tpu.dot_dimension_numbers<[1], [1], [0], [0], [0, 0, 1, 0], [], []>} : vector<16x8xf32>, vector<16x8xf32>, vector<16x16xf32> -> vector<16x16xf32>
    %79 = arith.addf %78, %3 : vector<16x16xf32>
    %cst_28 = arith.constant dense<0xFF800000> : vector<16xf32>
    %80 = vector.multi_reduction <maximumf>, %79, %cst_28 [1] : vector<16x16xf32> to vector<16xf32>
    %81 = vector.shape_cast %80 : vector<16xf32> to vector<16x1xf32>
    %82 = vector.broadcast %81 : vector<16x1xf32> to vector<16x16xf32>
    %83 = arith.subf %79, %82 : vector<16x16xf32>
    %84 = math.exp %83 : vector<16x16xf32>
    %cst_29 = arith.constant dense<0.000000e+00> : vector<16xf32>
    %85 = vector.multi_reduction <add>, %84, %cst_29 [1] : vector<16x16xf32> to vector<16xf32>
    %86 = vector.shape_cast %85 : vector<16xf32> to vector<16x1xf32>
    %87 = tpu.reciprocal %86 {approx = true} : vector<16x1xf32> -> vector<16x1xf32>
    %88 = vector.broadcast %87 : vector<16x1xf32> to vector<16x16xf32>
    %89 = arith.mulf %84, %88 : vector<16x16xf32>
    %cst_30 = arith.constant dense<0.000000e+00> : vector<16x8xf32>
    %90 = tpu.matmul %89, %77, %cst_30 {dimension_numbers = #tpu.dot_dimension_numbers<[1], [0], [0], [1], [0, 0, 1, 1], [], []>} : vector<16x16xf32>, vector<16x8xf32>, vector<16x8xf32> -> vector<16x8xf32>
    %c0_31 = arith.constant 0 : index
    %c16_32 = arith.constant 16 : index
    %91 = vector.load %arg6[%c0_31, %c16_32] : memref<16x32xf32, #tpu.memory_space<vmem>>, vector<16x8xf32>
    tpu.vector_store %arg6[%c0_31, %c16_32], %90 {strides = array<i32>} : memref<16x32xf32, #tpu.memory_space<vmem>>, vector<16x8xf32>,
    %92 = vector.extract_strided_slice %34 {offsets = [0, 24], sizes = [16, 8], strides = [1, 1]} : vector<16x32xf32> to vector<16x8xf32>
    %93 = vector.extract_strided_slice %39 {offsets = [0, 24], sizes = [16, 8], strides = [1, 1]} : vector<16x32xf32> to vector<16x8xf32>
    %94 = vector.extract_strided_slice %40 {offsets = [0, 24], sizes = [16, 8], strides = [1, 1]} : vector<16x32xf32> to vector<16x8xf32>
    %cst_33 = arith.constant dense<0.000000e+00> : vector<16x16xf32>
    %95 = tpu.matmul %92, %93, %cst_33 {dimension_numbers = #tpu.dot_dimension_numbers<[1], [1], [0], [0], [0, 0, 1, 0], [], []>} : vector<16x8xf32>, vector<16x8xf32>, vector<16x16xf32> -> vector<16x16xf32>
    %96 = arith.addf %95, %3 : vector<16x16xf32>
    %cst_34 = arith.constant dense<0xFF800000> : vector<16xf32>
    %97 = vector.multi_reduction <maximumf>, %96, %cst_34 [1] : vector<16x16xf32> to vector<16xf32>
    %98 = vector.shape_cast %97 : vector<16xf32> to vector<16x1xf32>
    %99 = vector.broadcast %98 : vector<16x1xf32> to vector<16x16xf32>
    %100 = arith.subf %96, %99 : vector<16x16xf32>
    %101 = math.exp %100 : vector<16x16xf32>
    %cst_35 = arith.constant dense<0.000000e+00> : vector<16xf32>
    %102 = vector.multi_reduction <add>, %101, %cst_35 [1] : vector<16x16xf32> to vector<16xf32>
    %103 = vector.shape_cast %102 : vector<16xf32> to vector<16x1xf32>
    %104 = tpu.reciprocal %103 {approx = true} : vector<16x1xf32> -> vector<16x1xf32>
    %105 = vector.broadcast %104 : vector<16x1xf32> to vector<16x16xf32>
    %106 = arith.mulf %101, %105 : vector<16x16xf32>
    %cst_36 = arith.constant dense<0.000000e+00> : vector<16x8xf32>
    %107 = tpu.matmul %106, %94, %cst_36 {dimension_numbers = #tpu.dot_dimension_numbers<[1], [0], [0], [1], [0, 0, 1, 1], [], []>} : vector<16x16xf32>, vector<16x8xf32>, vector<16x8xf32> -> vector<16x8xf32>
    %c0_37 = arith.constant 0 : index
    %c24 = arith.constant 24 : index
    %108 = vector.load %arg6[%c0_37, %c24] : memref<16x32xf32, #tpu.memory_space<vmem>>, vector<16x8xf32>
    tpu.vector_store %arg6[%c0_37, %c24], %107 {strides = array<i32>} : memref<16x32xf32, #tpu.memory_space<vmem>>, vector<16x8xf32>,
    %c0_38 = arith.constant 0 : index
    %c0_39 = arith.constant 0 : index
    %109 = vector.load %arg6[%c0_38, %c0_39] : memref<16x32xf32, #tpu.memory_space<vmem>>, vector<16x32xf32>
    %c0_40 = arith.constant 0 : index
    %c640 = arith.constant 640 : index
    %110 = vector.load %arg4[%c0_40, %c640] : memref<32x672xf32, #tpu.memory_space<vmem>>, vector<32x32xf32>
    %cst_41 = arith.constant dense<0.000000e+00> : vector<16x32xf32>
    %111 = tpu.matmul %109, %110, %cst_41 {dimension_numbers = #tpu.dot_dimension_numbers<[1], [0], [0], [1], [0, 0, 1, 1], [], []>} : vector<16x32xf32>, vector<32x32xf32>, vector<16x32xf32> -> vector<16x32xf32>
    %112 = arith.addf %0, %111 : vector<16x32xf32>
    %113 = vector.broadcast %6 : vector<1x32xf32> to vector<16x32xf32>
    %114 = arith.addf %112, %113 : vector<16x32xf32>
    %cst_42 = arith.constant dense<0.000000e+00> : vector<16xf32>
    %115 = vector.multi_reduction <add>, %114, %cst_42 [1] : vector<16x32xf32> to vector<16xf32>
    %116 = vector.shape_cast %115 : vector<16xf32> to vector<16x1xf32>
    %cst_43 = arith.constant 3.200000e+01 : f32
    %117 = vector.broadcast %cst_43 : f32 to vector<16x1xf32>
    %118 = arith.divf %116, %117 : vector<16x1xf32>
    %119 = vector.broadcast %118 : vector<16x1xf32> to vector<16x32xf32>
    %120 = arith.subf %114, %119 : vector<16x32xf32>
    %121 = arith.mulf %120, %120 : vector<16x32xf32>
    %cst_44 = arith.constant dense<0.000000e+00> : vector<16xf32>
    %122 = vector.multi_reduction <add>, %121, %cst_44 [1] : vector<16x32xf32> to vector<16xf32>
    %123 = vector.shape_cast %122 : vector<16xf32> to vector<16x1xf32>
    %cst_45 = arith.constant 3.200000e+01 : f32
    %124 = vector.broadcast %cst_45 : f32 to vector<16x1xf32>
    %125 = arith.divf %123, %124 : vector<16x1xf32>
    %126 = vector.broadcast %118 : vector<16x1xf32> to vector<16x32xf32>
    %127 = arith.subf %114, %126 : vector<16x32xf32>
    %cst_46 = arith.constant 9.99999974E-6 : f32
    %128 = vector.broadcast %cst_46 : f32 to vector<16x1xf32>
    %129 = arith.addf %125, %128 : vector<16x1xf32>
    %130 = math.rsqrt %129 : vector<16x1xf32>
    %131 = vector.broadcast %130 : vector<16x1xf32> to vector<16x32xf32>
    %132 = arith.mulf %127, %131 : vector<16x32xf32>
    %c0_47 = arith.constant 0 : index
    %c0_48 = arith.constant 0 : index
    %133 = vector.load %arg4[%c0_47, %c0_48] : memref<32x672xf32, #tpu.memory_space<vmem>>, vector<32x256xf32>
    %cst_49 = arith.constant dense<0.000000e+00> : vector<16x256xf32>
    %134 = tpu.matmul %132, %133, %cst_49 {dimension_numbers = #tpu.dot_dimension_numbers<[1], [0], [0], [1], [0, 0, 1, 1], [], []>} : vector<16x32xf32>, vector<32x256xf32>, vector<16x256xf32> -> vector<16x256xf32>
    %135 = vector.broadcast %4 : vector<1x256xf32> to vector<16x256xf32>
    %136 = arith.addf %134, %135 : vector<16x256xf32>
    %137 = vector.extract_strided_slice %136 {offsets = [0, 0], sizes = [16, 128], strides = [1, 1]} : vector<16x256xf32> to vector<16x128xf32>
    %138 = vector.extract_strided_slice %136 {offsets = [0, 128], sizes = [16, 128], strides = [1, 1]} : vector<16x256xf32> to vector<16x128xf32>
    %cst_50 = arith.constant 5.000000e-01 : f32
    %139 = vector.broadcast %cst_50 : f32 to vector<16x128xf32>
    %140 = arith.mulf %139, %138 : vector<16x128xf32>
    %141 = math.tanh %140 : vector<16x128xf32>
    %cst_51 = arith.constant 5.000000e-01 : f32
    %142 = vector.broadcast %cst_51 : f32 to vector<16x128xf32>
    %143 = arith.mulf %142, %141 : vector<16x128xf32>
    %cst_52 = arith.constant 5.000000e-01 : f32
    %144 = vector.broadcast %cst_52 : f32 to vector<16x128xf32>
    %145 = arith.addf %143, %144 : vector<16x128xf32>
    %146 = arith.mulf %138, %145 : vector<16x128xf32>
    %147 = arith.mulf %137, %146 : vector<16x128xf32>
    %c0_53 = arith.constant 0 : index
    %c256 = arith.constant 256 : index
    %148 = vector.load %arg4[%c0_53, %c256] : memref<32x672xf32, #tpu.memory_space<vmem>>, vector<32x128xf32>
    %cst_54 = arith.constant dense<0.000000e+00> : vector<16x32xf32>
    %149 = tpu.matmul %147, %148, %cst_54 {dimension_numbers = #tpu.dot_dimension_numbers<[1], [1], [0], [0], [0, 0, 1, 0], [], []>} : vector<16x128xf32>, vector<32x128xf32>, vector<16x32xf32> -> vector<16x32xf32>
    %150 = vector.broadcast %7 : vector<1x32xf32> to vector<16x32xf32>
    %151 = arith.addf %149, %150 : vector<16x32xf32>
    %152 = arith.addf %114, %151 : vector<16x32xf32>
    %c0_55 = arith.constant 0 : index
    %c0_56 = arith.constant 0 : index
    %153 = vector.load %arg5[%c0_55, %c0_56] : memref<16x32xf32, #tpu.memory_space<vmem>>, vector<16x32xf32>
    tpu.vector_store %arg5[%c0_55, %c0_56], %152 {strides = array<i32>} : memref<16x32xf32, #tpu.memory_space<vmem>>, vector<16x32xf32>,
    return
  }
  func.func @transform_0(%arg0: i32) -> (i32, i32) {
    %c0_i32 = arith.constant 0 : i32
    %c0_i32_0 = arith.constant 0 : i32
    %c0_i32_1 = arith.constant 0 : i32
    return %c0_i32, %c0_i32_0 : i32, i32
  }
  func.func @transform_1(%arg0: i32) -> (i32, i32) {
    %c0_i32 = arith.constant 0 : i32
    %c0_i32_0 = arith.constant 0 : i32
    %c0_i32_1 = arith.constant 0 : i32
    return %c0_i32, %c0_i32_0 : i32, i32
  }
  func.func @transform_2(%arg0: i32) -> (i32, i32) {
    %c0_i32 = arith.constant 0 : i32
    %c0_i32_0 = arith.constant 0 : i32
    %c0_i32_1 = arith.constant 0 : i32
    return %c0_i32, %c0_i32_0 : i32, i32
  }
  func.func @transform_3(%arg0: i32) -> (i32, i32) {
    %c0_i32 = arith.constant 0 : i32
    %c0_i32_0 = arith.constant 0 : i32
    %c0_i32_1 = arith.constant 0 : i32
    return %c0_i32, %c0_i32_0 : i32, i32
  }
  func.func @transform_4(%arg0: i32) -> (i32, i32) {
    %c0_i32 = arith.constant 0 : i32
    %c0_i32_0 = arith.constant 0 : i32
    %c0_i32_1 = arith.constant 0 : i32
    return %c0_i32, %c0_i32_0 : i32, i32
  }
}

</mosaic_0001>

<bundles_post_ra>
// kernel: tpu_custom_call.1
= control target key start
LH: loop header
LB: loop body
LE: loop exit
PB: predicated region body
PF: predicated region fallthrough
CT: control target
= control target key end

     0   :  { %9 = vsyncpa [#allocation4], 0  ;;  %s1925_s0 = inlined_call_operand.vmem [shape: f32[16,32], index: 0, kind: input, shape index: {}]   ;;  %s1926_s1 = inlined_call_operand.vmem [shape: f32[48,32], index: 1, kind: input, shape index: {}]   ;;  %s1927_s2 = inlined_call_operand.vmem [shape: f32[4,256], index: 2, kind: input, shape index: {}]   ;;  %s1928_s3 = inlined_call_operand.hbm [shape: f32[32,672], index: 3, kind: input, shape index: {}]   ;;  %s1929_s4 = inlined_call_operand.hbm [shape: f32[16,32], index: 4, kind: output, shape index: {}]  }
   0x1   :  { %10 = vsyncpa [#allocation5], 0  ;;  %s1660_s15 = smov [#allocation3]  }
   0x2   :  { %s22_s16 = sshll.u32 %s1660_s15, 4  ;;  %s23_s16 = int_to_ptr.vmem [resolvable:$true] %s22_s16 }
   0x3   :  { %s1624_s17 = scalar_lea.vmem %s23_s16, 3072  ;;  %p1629_p1 = scmp.lt.s32.totalorder %s23_s16, %s23_s16 }
   0x4   :  { %p1625_p0 = scmp.ne.s32.totalorder %s23_s16, %s1624_s17  ;;  %p1630_p2 = scmp.lt.s32.totalorder %s1624_s17, %s1624_s17 }
   0x6   :  { %p1631_p3 = por %p1630_p2, %p1629_p1 }
   0x8   :  { %p1632_p4 = pnand %p1631_p3, %p1625_p0 }
   0xa   :  { %1635 = shalt.err (!%p1632_p4)
}
   0xb   :  { %s1661_s18 = smov 768   ;;  %s1662_s19 = smov 48  }
   0xc   :  { %28 = dma.hbm_to_vmem [thread:$0]  %s1928_s3, 3072, %s23_s16, [#allocation4], %s1661_s18, %s1661_s18, %s1662_s19  }
   0xd   :  { %1656 = dma.done.wait [#allocation4], 3072  }
   0xe   :  { %1657 = vsyncadd [#allocation4], 4294964224  ;;  %vm45_vm0 = vcmask 261120   ;;  %v1712_v0 = vld [vmem:[%s1925_s0] sm:$0xff]  ;;  %v1717_v1 = vld [vmem:[%s1925_s0 + $0x8] sm:$0xff]  ;;  %v1663_v18 = vmov 0.0   ;;  %v82_v37 = vlaneseq }
   0xf   :  { %v46_v2 = vsel %vm45_vm0, %v1712_v0, 0.0  ;;  %v49_v3 = vsel %vm45_vm0, %v1717_v1, 0.0  ;;  %v80_v14 = vld [vmem:[#allocation3 + $0xb0] sm:$0xff]  ;;  %v79_v15 = vld [vmem:[#allocation3 + $0xa8] sm:$0xff]  ;;  %v78_v16 = vld [vmem:[#allocation3 + $0x80] sm:$0xff]  ;;  %162 = vmatprep.mubr.f32.mxu1 %v1663_v18  ;;  %s1664_s28 = smov 96  }
  0x10   :  { %47 = vadd.xlane.f32.xlu0 %v46_v2  ;;  %122 = vmatprep.subr.mxu1 %v80_v14  ;;  %v77_v17 = vld [vmem:[#allocation3 + $0x78] sm:$0xff]  ;;  %v76_v19 = vld [vmem:[#allocation3 + $0x50] sm:$0xff]  ;;  %v75_v20 = vld [vmem:[#allocation3 + $0x48] sm:$0xff]  ;;  %s1665_s7 = smov 32   ;;  %v1750_v38 = vshrl.u32 %v82_v37, 7  ;;  %vm225_vm1 = vcmask 64512  }
  0x11   :  { %123 = vmatpush1.msra.mxu1 %v79_v15  ;;  %v74_v21 = vld [vmem:[#allocation3 + $0x20] sm:$0xff]  ;;  %v73_v22 = vld [vmem:[#allocation3 + $0x18] sm:$0xff]  ;;  %v37_v24 = vld [vmem:[%s1926_s1 + $0x18] sm:$0xff]  ;;  %s1666_s10 = smov 88   ;;  %s1667_s11 = smov 80   ;;  %vm311_vm2 = vcmask 130048  }
  0x12   :  { %124 = vmatprep.subr.mxu1 %v78_v16  ;;  %v36_v23 = vld [vmem:[%s1926_s1 + $0x10] sm:$0xff]  ;;  %v34_v25 = vld [vmem:[%s1926_s1] sm:$0xff]  ;;  %v1742_v26 = vld [vmem:[%s1926_s1 + $0x8] sm:$0xff]  ;;  %v84_v39 = vsub.s32 0, %v1750_v38  ;;  %v88_v44 = vsub.s32 1, %v1750_v38  ;;  %s1668_s12 = smov 120  }
  0x13   :  { %125 = vmatpush1.msra.mxu1 %v77_v17  ;;  %v1397_v40 = vld [vmem:[%s1927_s2 + $0x1] ss:$4 sm:$0x3]  ;;  %s1669_s13 = smov 112   ;;  %s1671_s18 = smov 56   ;;  %vm633_vm3 = vcmask 130112  }
  0x14   :  { %50 = vadd.xlane.f32.xlu0 %v49_v3  ;;  %126 = vmatprep.subr.mxu1 %v76_v19  ;;  %v85_v41 = vrot.slane %v1397_v40, %v84_v39  ;;  %v89_v49 = vrot.slane %v1397_v40, %v88_v44  ;;  %s1673_s20 = smov 104   ;;  %s1674_s21 = smov 40   ;;  %vm844_vm4 = vcmask 195712   ;;  %vm1055_vm5 = vcmask 261312  }
  0x15   :  { %127 = vmatpush1.msra.mxu1 %v75_v20  ;;  %s1675_s22 = smov 8   ;;  %s1676_s23 = smov 16  }
  0x16   :  { %128 = vmatprep.subr.mxu1 %v74_v21  ;;  %v1819_v21 = vld [vmem:[%s1926_s1 + $0x28] sm:$0xff]  ;;  %s1677_s24 = smov 24   ;;  %s1678_s29 = smov [#allocation6]  }
  0x17   :  { %129 = vmatpush1.msra.mxu1 %v73_v22  ;;  %s1385_s30 = sshll.u32 %s1678_s29, 4  ;;  %s1386_s30 = int_to_ptr.vmem [resolvable:$true] %s1385_s30 }
  0x18   :  { %s1636_s5 = scalar_lea.vmem %s1386_s30, 256  ;;  %p1641_p6 = scmp.lt.s32.totalorder %s1386_s30, %s1386_s30 }
  0x19   :  { %p1637_p5 = scmp.ne.s32.totalorder %s1386_s30, %s1636_s5  ;;  %p1642_p7 = scmp.lt.s32.totalorder %s1636_s5, %s1636_s5 }
  0x1b   :  { %p1643_p8 = por %p1642_p7, %p1641_p6 }
  0x1d   :  { %p1644_p9 = pnand %p1643_p8, %p1637_p5 }
  0x2a   :  { %179 = vrot.lane.b32.xlu0 %v36_v23, %s1664_s28 }
  0x2e   :  { %199 = vrot.lane.b32.xlu0 %v34_v25, %s1665_s7 }
  0x99   :  { %v48_v4 = vpop.xlane.xlu0 %47 }
  0x9a   :  { %v53_v5 = vmul.f32 0.03125, %v48_v4 }
  0x9c   :  { %v55_v6 = vsub.f32 %v1712_v0, %v53_v5 }
  0x9d   :  { %v51_v7 = vpop.xlane.xlu0 %50 }
  0x9e   :  { %v54_v8 = vmul.f32 0.03125, %v51_v7  ;;  %v57_v9 = vmul.f32 %v55_v6, %v55_v6 }
  0xa0   :  { %v56_v10 = vsub.f32 %v1717_v1, %v54_v8  ;;  %v59_v11 = vsel %vm45_vm0, %v57_v9, 0.0 }
  0xa1   :  { %60 = vadd.xlane.f32.xlu1 %v59_v11  ;;  %v180_v45 = vpop.permute.xlu0 %179 }
  0xa2   :  { %v58_v12 = vmul.f32 %v56_v10, %v56_v10 }
  0xa4   :  { %v62_v13 = vsel %vm45_vm0, %v58_v12, 0.0 }
  0xa5   :  { %63 = vadd.xlane.f32.xlu1 %v62_v13  ;;  %v200_v58 = vpop.permute.xlu0 %199 }
  0xb6   :  { %181 = vrot.lane.b32.xlu1 %v37_v24, %s1664_s28 }
  0xba   :  { %201 = vrot.lane.b32.xlu1 %v1742_v26, %s1665_s7 }
 0x12a   :  { %v61_v27 = vpop.xlane.xlu1 %60 }
 0x12b   :  { %v65_v28 = vmul.f32 0.03125, %v61_v27 }
 0x12d   :  { %v67_v29 = vadd.f32 1e-05, %v65_v28 }
 0x12e   :  { %v64_v30 = vpop.xlane.xlu1 %63 }
 0x12f   :  { %1572 = vrsqrt.f32 %v67_v29  ;;  %v66_v31 = vmul.f32 0.03125, %v64_v30 }
 0x131   :  { %v68_v32 = vadd.f32 1e-05, %v66_v31 }
 0x132   :  { %v182_v56 = vpop.permute.xlu1 %181 }
 0x133   :  { %1574 = vrsqrt.f32 %v68_v32 }
 0x136   :  { %v202_v62 = vpop.permute.xlu1 %201 }
 0x13c   :  { %v1573_v33 = vpop.eup %1572 }
 0x13d   :  { %v71_v34 = vmul.f32 %v1573_v33, %v55_v6 }
 0x13f   :  { %1398 = vmatmul.mubr.msk.f32.vlgmr.msra.gmra.mxu1 %vm45_vm0, %v71_v34 }
 0x140   :  { %v1575_v35 = vpop.eup %1574  ;;  %168 = vmatprep.mubr.f32.mxu1 %v1663_v18 }
 0x141   :  { %v72_v36 = vmul.f32 %v1575_v35, %v56_v10 }
 0x143   :  { %1399 = vmatmul.mubr.msk.f32.gmra.mxu1 %vm45_vm0, %v72_v36 }
 0x1ff   :  { %v164_v42 = vpop.f32.mrf.mxu1 }
 0x200   :  { %v1758_v43 = vadd.f32 %v164_v42, %v85_v41 }
 0x201   :  { %v166_v46 = vpop.f32.mrf.mxu1 }
 0x202   :  { %v185_v47 = vmul.f32 %v180_v45, %v1758_v43  ;;  %v167_v52 = vadd.f32 %v166_v46, %v89_v49  ;;  %v175_v59 = vmul.f32 %v1758_v43, %v34_v25  ;;  %v205_v4 = vmul.f32 %v200_v58, %v1758_v43 }
 0x203   :  { %v170_v48 = vpop.f32.mrf.mxu1 }
 0x204   :  { %189 = vrot.lane.b32.xlu0 %v185_v47, %s1665_s7  ;;  %v207_v54 = vmul.f32 %v167_v52, %v36_v23  ;;  %v1766_v55 = vadd.f32 %v170_v48, %v85_v41 }
 0x205   :  { %v172_v50 = vpop.f32.mrf.mxu1 }
 0x206   :  { %v173_v51 = vadd.f32 %v172_v50, %v89_v49  ;;  %v186_v57 = vmul.f32 %v182_v56, %v1766_v55  ;;  %v206_v63 = vmul.f32 %v202_v62, %v1766_v55  ;;  %v176_v8 = vmul.f32 %v1766_v55, %v1742_v26  ;;  %v1826_v26 = vld [vmem:[%s1926_s1 + $0x20] sm:$0xff]  ;;  %s1670_s1 = smov 64  }
 0x208   :  { %v208_v53 = vmul.f32 %v173_v51, %v37_v24 }
 0x20a   :  { %213 = vrot.lane.b32.xlu1 %v208_v53, %s1665_s7 }
 0x20e   :  { %211 = vrot.lane.b32.xlu1 %v207_v54, %s1665_s7 }
 0x212   :  { %191 = vrot.lane.b32.xlu1 %v186_v57, %s1665_s7 }
 0x276   :  { %v190_v60 = vpop.permute.xlu0 %189 }
 0x277   :  { %v1772_v61 = vadd.f32 %v190_v60, %v175_v59 }
 0x279   :  { %1478 = vmatprep.mubr.msk.f32.mxu1 %vm225_vm1, %v1772_v61 }
 0x27c   :  { %v214_v2 = vpop.permute.xlu1 %213 }
 0x27d   :  { %v1777_v3 = vadd.f32 %v214_v2, %v206_v63 }
 0x27f   :  { %431 = vrot.lane.b32.xlu1 %v1777_v3, %s1666_s10  ;;  %223 = vrot.lane.b32.xlu0 %v1777_v3, %s1664_s28 }
 0x280   :  { %v212_v5 = vpop.permute.xlu1 %211 }
 0x281   :  { %v1783_v6 = vadd.f32 %v212_v5, %v205_v4 }
 0x283   :  { %429 = vrot.lane.b32.xlu1 %v1783_v6, %s1666_s10  ;;  %221 = vrot.lane.b32.xlu0 %v1783_v6, %s1664_s28 }
 0x284   :  { %v192_v7 = vpop.permute.xlu1 %191 }
 0x285   :  { %v1792_v9 = vadd.f32 %v192_v7, %v176_v8 }
 0x287   :  { %642 = vrot.lane.b32.xlu1 %v1777_v3, %s1667_s11  ;;  %425 = vrot.lane.b32.xlu0 %v1772_v61, %s1668_s12 }
 0x28b   :  { %640 = vrot.lane.b32.xlu1 %v1783_v6, %s1667_s11  ;;  %427 = vrot.lane.b32.xlu0 %v1792_v9, %s1668_s12 }
 0x28f   :  { %638 = vrot.lane.b32.xlu1 %v1792_v9, %s1669_s13  ;;  %636 = vrot.lane.b32.xlu0 %v1772_v61, %s1669_s13 }
 0x2f1   :  { %v432_v10 = vpop.permute.xlu1 %431  ;;  %v224_v11 = vpop.permute.xlu0 %223 }
 0x2f2   :  { %1474 = vmatprep.subr.msk.mxu1 %vm225_vm1, %v224_v11  ;;  %1488 = vmatprep.subr.msk.mxu0 %vm225_vm1, %v432_v10 }
 0x2f3   :  { %1475 = vmatpush3.xpose.msk.msra.mxu1 %vm225_vm1, %v224_v11  ;;  %1489 = vmatpush3.xpose.msk.msra.mxu0 %vm225_vm1, %v432_v10 }
 0x2f5   :  { %v430_v12 = vpop.permute.xlu1 %429  ;;  %v222_v13 = vpop.permute.xlu0 %221 }
 0x2f6   :  { %1476 = vmatprep.subr.msk.mxu1 %vm225_vm1, %v222_v13  ;;  %1490 = vmatprep.subr.msk.mxu0 %vm225_vm1, %v430_v12 }
 0x2f7   :  { %1477 = vmatpush3.xpose.msk.msra.mxu1 %vm225_vm1, %v222_v13  ;;  %1491 = vmatpush3.xpose.msk.msra.mxu0 %vm225_vm1, %v430_v12 }
 0x2f9   :  { %v643_v14 = vpop.permute.xlu1 %642  ;;  %v426_v15 = vpop.permute.xlu0 %425 }
 0x2fa   :  { %1479 = vmatmul.mubr.msk.f32.vlgmr.msra.gmra.mxu1 %vm225_vm1, %v1792_v9  ;;  %1492 = vmatprep.mubr.msk.f32.mxu0 %vm225_vm1, %v426_v15 }
 0x2fb   :  { %1502 = vmatprep.subr.msk.mxu0 %vm225_vm1, %v643_v14 }
 0x2fd   :  { %v641_v16 = vpop.permute.xlu1 %640  ;;  %v428_v17 = vpop.permute.xlu0 %427 }
 0x2fe   :  { %1493 = vmatmul.mubr.msk.f32.vlgmr.msra.gmra.mxu0 %vm225_vm1, %v428_v17 }
 0x2ff   :  { %1503 = vmatpush3.xpose.msk.msra.mxu0 %vm225_vm1, %v643_v14 }
 0x300   :  { %1504 = vmatprep.subr.msk.mxu0 %vm225_vm1, %v641_v16 }
 0x301   :  { %v637_v19 = vpop.permute.xlu0 %636  ;;  %v639_v20 = vpop.permute.xlu1 %638 }
 0x302   :  { %1506 = vmatprep.mubr.msk.f32.mxu0 %vm225_vm1, %v637_v19 }
 0x303   :  { %1505 = vmatpush3.xpose.msk.msra.mxu0 %vm225_vm1, %v641_v16 }
 0x306   :  { %1507 = vmatmul.mubr.msk.f32.vlgmr.msra.gmra.mxu0 %vm225_vm1, %v639_v20 }
 0x3ba   :  { %v1480_v22 = vpop.f32.mrf.mxu1 }
 0x3bb   :  { %v308_v23 = vadd.f32 %v1480_v22, %v1819_v21 }
 0x3bc   :  { %v302_v25 = vpop.f32.mrf.mxu1 }
 0x3bd   :  { %v315_v24 = vsel %vm311_vm2, %v308_v23, -inf  ;;  %v303_v29 = vadd.f32 %v302_v25, %v1826_v26 }
 0x3be   :  { %316 = vmax.xlane.f32.xlu1 %v315_v24  ;;  %v1494_v27 = vpop.f32.mrf.mxu0 }
 0x3bf   :  { %v513_v28 = vadd.f32 %v1494_v27, %v1819_v21  ;;  %v312_v33 = vsel %vm311_vm2, %v303_v29, -inf }
 0x3c0   :  { %v507_v31 = vpop.f32.mrf.mxu0 }
 0x3c1   :  { %v519_v30 = vsel %vm311_vm2, %v513_v28, -inf  ;;  %v508_v32 = vadd.f32 %v507_v31, %v1826_v26 }
 0x3c2   :  { %520 = vmax.xlane.f32.xlu0 %v519_v30 }
 0x3c3   :  { %v516_v41 = vsel %vm311_vm2, %v508_v32, -inf }
 0x3c6   :  { %v1508_v34 = vpop.f32.mrf.mxu0  ;;  %313 = vmax.xlane.f32.xlu0 %v312_v33 }
 0x3c7   :  { %v724_v35 = vadd.f32 %v1508_v34, %v1819_v21 }
 0x3c8   :  { %v718_v36 = vpop.f32.mrf.mxu0 }
 0x3c9   :  { %v719_v37 = vadd.f32 %v718_v36, %v1826_v26  ;;  %v730_v40 = vsel %vm311_vm2, %v724_v35, -inf }
 0x3ca   :  { %731 = vmax.xlane.f32.xlu1 %v730_v40  ;;  %517 = vmax.xlane.f32.xlu0 %v516_v41 }
 0x3cb   :  { %v727_v42 = vsel %vm311_vm2, %v719_v37, -inf }
 0x3ce   :  { %728 = vmax.xlane.f32.xlu0 %v727_v42 }
 0x3db   :  { %336 = vrot.lane.b32.xlu1 %v1758_v43, %s1670_s1 }
 0x3df   :  { %540 = vrot.lane.b32.xlu1 %v1766_v55, %s1671_s18 }
 0x3e3   :  { %538 = vrot.lane.b32.xlu1 %v1758_v43, %s1671_s18 }
 0x3e4   :  { %338 = vrot.lane.b32.xlu0 %v1766_v55, %s1670_s1 }
 0x3e7   :  { %749 = vrot.lane.b32.xlu1 %v1758_v43, %s1662_s19 }
 0x3e8   :  { %751 = vrot.lane.b32.xlu0 %v1766_v55, %s1662_s19  ;;  %s1672_s19 = smov 72  }
 0x447   :  { %v317_v45 = vpop.xlane.xlu1 %316 }
 0x448   :  { %v319_v46 = vsub.f32 %v308_v23, %v317_v45 }
 0x44a   :  { %v322_v47 = vmul.f32 1.442695, %v319_v46 }
 0x44b   :  { %v521_v48 = vpop.xlane.xlu0 %520 }
 0x44c   :  { %1576 = vpow2.f32 %v322_v47  ;;  %v523_v49 = vsub.f32 %v513_v28, %v521_v48 }
 0x44e   :  { %v526_v50 = vmul.f32 1.442695, %v523_v49 }
 0x44f   :  { %v314_v51 = vpop.xlane.xlu0 %313 }
 0x450   :  { %1578 = vpow2.f32 %v526_v50  ;;  %v318_v52 = vsub.f32 %v303_v29, %v314_v51 }
 0x452   :  { %v320_v53 = vmul.f32 1.442695, %v318_v52 }
 0x453   :  { %v732_v54 = vpop.xlane.xlu1 %731  ;;  %v518_v56 = vpop.xlane.xlu0 %517 }
 0x454   :  { %1580 = vpow2.f32 %v320_v53  ;;  %v734_v57 = vsub.f32 %v724_v35, %v732_v54  ;;  %v522_v58 = vsub.f32 %v508_v32, %v518_v56 }
 0x456   :  { %v737_v59 = vmul.f32 1.442695, %v734_v57  ;;  %v524_v60 = vmul.f32 1.442695, %v522_v58 }
 0x457   :  { %v729_v62 = vpop.xlane.xlu0 %728  ;;  %v337_v4 = vpop.permute.xlu1 %336 }
 0x458   :  { %1582 = vpow2.f32 %v737_v59  ;;  %v733_v63 = vsub.f32 %v719_v37, %v729_v62 }
 0x459   :  { %v1577_v2 = vpop.eup %1576  ;;  %1584 = vpow2.f32 %v524_v60 }
 0x45a   :  { %v735_v5 = vmul.f32 1.442695, %v733_v63  ;;  %v327_v7 = vsel %vm311_vm2, %v1577_v2, 0.0 }
 0x45b   :  { %328 = vadd.xlane.f32.xlu1 %v327_v7  ;;  %v339_v8 = vpop.permute.xlu0 %338  ;;  %v541_v12 = vpop.permute.xlu1 %540 }
 0x45c   :  { %1586 = vpow2.f32 %v735_v5  ;;  %1481 = vmatprep.subr.mxu1 %v339_v8 }
 0x45d   :  { %v1579_v10 = vpop.eup %1578  ;;  %1482 = vmatpush3.msra.mxu1 %v339_v8 }
 0x45e   :  { %1483 = vmatprep.subr.mxu1 %v337_v4  ;;  %v531_v11 = vsel %vm311_vm2, %v1579_v10, 0.0 }
 0x45f   :  { %532 = vadd.xlane.f32.xlu1 %v531_v11  ;;  %1484 = vmatpush3.msra.mxu1 %v337_v4  ;;  %v539_v23 = vpop.permute.xlu1 %538  ;;  %v752_v25 = vpop.permute.xlu0 %751 }
 0x460   :  { %1495 = vmatprep.subr.mxu1 %v541_v12 }
 0x461   :  { %v1581_v13 = vpop.eup %1580 }
 0x462   :  { %v324_v14 = vsel %vm311_vm2, %v1581_v13, 0.0 }
 0x463   :  { %325 = vadd.xlane.f32.xlu0 %v324_v14  ;;  %v750_v24 = vpop.permute.xlu1 %749 }
 0x465   :  { %v1583_v15 = vpop.eup %1582 }
 0x466   :  { %v1585_v16 = vpop.eup %1584  ;;  %v742_v17 = vsel %vm311_vm2, %v1583_v15, 0.0 }
 0x467   :  { %743 = vadd.xlane.f32.xlu1 %v742_v17  ;;  %v528_v19 = vsel %vm311_vm2, %v1585_v16, 0.0 }
 0x468   :  { %529 = vadd.xlane.f32.xlu0 %v528_v19 }
 0x469   :  { %v1587_v20 = vpop.eup %1586 }
 0x46a   :  { %v739_v22 = vsel %vm311_vm2, %v1587_v20, 0.0 }
 0x46c   :  { %740 = vadd.xlane.f32.xlu0 %v739_v22 }
 0x478   :  { %851 = vrot.lane.b32.xlu1 %v1783_v6, %s1672_s19 }
 0x47c   :  { %849 = vrot.lane.b32.xlu1 %v1792_v9, %s1673_s20 }
 0x482   :  { %853 = vrot.lane.b32.xlu0 %v1777_v3, %s1672_s19 }
 0x486   :  { %847 = vrot.lane.b32.xlu0 %v1772_v61, %s1673_s20 }
 0x4e4   :  { %v329_v27 = vpop.xlane.xlu1 %328 }
 0x4e5   :  { %1588 = vrcp.f32 %v329_v27  ;;  %v1061_v27 = vld [vmem:[#allocation3 + $0x58] sm:$0xff] }
 0x4e8   :  { %v533_v29 = vpop.xlane.xlu1 %532 }
 0x4ec   :  { %v326_v28 = vpop.xlane.xlu0 %325 }
 0x4ed   :  { %1590 = vrcp.f32 %v326_v28  ;;  %v1060_v28 = vld [vmem:[#allocation3 + $0x28] sm:$0xff] }
 0x4ee   :  { %1592 = vrcp.f32 %v533_v29 }
 0x4f0   :  { %v744_v31 = vpop.xlane.xlu1 %743 }
 0x4f1   :  { %v530_v30 = vpop.xlane.xlu0 %529 }
 0x4f2   :  { %1594 = vrcp.f32 %v530_v30  ;;  %v1589_v9 = vpop.eup %1588 }
 0x4f3   :  { %1596 = vrcp.f32 %v744_v31  ;;  %v333_v33 = vmul.f32 %v1589_v9, %v1577_v2 }
 0x4f4   :  { %v852_v47 = vpop.permute.xlu1 %851 }
 0x4f5   :  { %v741_v6 = vpop.xlane.xlu0 %740 }
 0x4f6   :  { %1598 = vrcp.f32 %v741_v6 }
 0x4f8   :  { %v850_v48 = vpop.permute.xlu1 %849 }
 0x4f9   :  { %v854_v36 = vpop.permute.xlu0 %853 }
 0x4fa   :  { %v1591_v32 = vpop.eup %1590 }
 0x4fb   :  { %v332_v3 = vmul.f32 %v1591_v32, %v1581_v13  ;;  %v1593_v61 = vpop.eup %1592 }
 0x4fc   :  { %v537_v37 = vmul.f32 %v1593_v61, %v1579_v10 }
 0x4fd   :  { %1485 = vmatprep.mubr.msk.f32.mxu1 %vm311_vm2, %v332_v3  ;;  %v848_v46 = vpop.permute.xlu0 %847  ;;  %v1426_v3 = vld [vmem:[%s1927_s2 + $0x2] ss:$0 sm:$0xff] }
 0x4fe   :  { %1486 = vmatmul.mubr.msk.f32.vlgmr.msra.gmra.mxu1 %vm311_vm2, %v333_v33 }
 0x4ff   :  { %v1595_v34 = vpop.eup %1594  ;;  %1496 = vmatpush3.msra.mxu1 %v541_v12 }
 0x500   :  { %1497 = vmatprep.subr.mxu1 %v539_v23  ;;  %v536_v35 = vmul.f32 %v1595_v34, %v1585_v16  ;;  %v1597_v40 = vpop.eup %1596 }
 0x501   :  { %1498 = vmatpush3.msra.mxu1 %v539_v23  ;;  %v748_v45 = vmul.f32 %v1597_v40, %v1583_v15 }
 0x502   :  { %1499 = vmatprep.mubr.msk.f32.mxu1 %vm311_vm2, %v536_v35  ;;  %1509 = vmatprep.subr.mxu1 %v752_v25 }
 0x503   :  { %v1599_v41 = vpop.eup %1598  ;;  %1500 = vmatmul.mubr.msk.f32.vlgmr.msra.gmra.mxu1 %vm311_vm2, %v537_v37 }
 0x504   :  { %1510 = vmatpush3.msra.mxu1 %v752_v25  ;;  %v747_v42 = vmul.f32 %v1599_v41, %v1587_v20  ;;  %v1062_v25 = vld [vmem:[#allocation3 + $0x88] sm:$0xff] }
 0x505   :  { %1511 = vmatprep.subr.mxu1 %v750_v24 }
 0x506   :  { %1512 = vmatpush3.msra.mxu1 %v750_v24  ;;  %1513 = vmatprep.mubr.msk.f32.mxu1 %vm311_vm2, %v747_v42 }
 0x507   :  { %1516 = vmatprep.subr.msk.mxu1 %vm225_vm1, %v854_v36  ;;  %1514 = vmatmul.mubr.msk.f32.vlgmr.msra.gmra.mxu1 %vm311_vm2, %v748_v45 }
 0x508   :  { %1517 = vmatpush3.xpose.msk.msra.mxu1 %vm225_vm1, %v854_v36  ;;  %1520 = vmatprep.mubr.msk.f32.mxu1 %vm225_vm1, %v848_v46 }
 0x509   :  { %1518 = vmatprep.subr.msk.mxu1 %vm225_vm1, %v852_v47 }
 0x50c   :  { %1519 = vmatpush3.xpose.msk.msra.mxu1 %vm225_vm1, %v852_v47 }
 0x50f   :  { %1521 = vmatmul.mubr.msk.f32.vlgmr.msra.gmra.mxu1 %vm225_vm1, %v850_v48 }
 0x510   :  { %1268 = vmatprep.mubr.f32.mxu1 %v1663_v18 }
 0x5be   :  { %v1487_v49 = vpop.f32.mrf.mxu1 }
 0x5bf   :  { %424 = vst.msk [vmem:[#allocation2 + $0x8] sm:$0xff] %vm225_vm1, %v1487_v49 }
 0x5c0   :  { %v414_v50 = vpop.f32.mrf.mxu1 }
 0x5c1   :  { %423 = vst.msk [vmem:[#allocation2] sm:$0xff] %vm225_vm1, %v414_v50 }
 0x5c3   :  { %v1501_v51 = vpop.f32.mrf.mxu1 }
 0x5c5   :  { %v616_v52 = vpop.f32.mrf.mxu1 }
 0x5c7   :  { %v1515_v53 = vpop.f32.mrf.mxu1 }
 0x5c9   :  { %v827_v54 = vpop.f32.mrf.mxu1 }
 0x5cf   :  { %v1522_v56 = vpop.f32.mrf.mxu1 }
 0x5d0   :  { %v935_v57 = vadd.f32 %v1522_v56, %v1819_v21  ;;  %v1183_v56 = vld [vmem:[#allocation3 + $0x60] sm:$0xff] }
 0x5d1   :  { %v929_v58 = vpop.f32.mrf.mxu1 }
 0x5d2   :  { %v930_v59 = vadd.f32 %v929_v58, %v1826_v26  ;;  %v941_v60 = vsel %vm311_vm2, %v935_v57, -inf  ;;  %v1181_v58 = vld [vmem:[#allocation3 + $0x30] sm:$0xff] }
 0x5d3   :  { %942 = vmax.xlane.f32.xlu1 %v941_v60  ;;  %v1179_v60 = vld [vmem:[#allocation3] sm:$0xff] }
 0x5d4   :  { %v938_v62 = vsel %vm311_vm2, %v930_v59, -inf }
 0x5d5   :  { %939 = vmax.xlane.f32.xlu0 %v938_v62 }
 0x5e4   :  { %960 = vrot.lane.b32.xlu1 %v1758_v43, %s1674_s21 }
 0x5e8   :  { %627 = vrot.lane.b32.xlu1 %v616_v52, %s1675_s22  ;;  %v1186_v52 = vld [vmem:[#allocation3 + $0x98] sm:$0xff] }
 0x5e9   :  { %1228 = vmatprep.subr.mxu1 %v1186_v52 }
 0x5ec   :  { %629 = vrot.lane.b32.xlu1 %v1501_v51, %s1675_s22 }
 0x5f0   :  { %840 = vrot.lane.b32.xlu1 %v1515_v53, %s1676_s23  ;;  %v1185_v53 = vld [vmem:[#allocation3 + $0x90] sm:$0xff] }
 0x5f1   :  { %1229 = vmatpush1.msra.mxu1 %v1185_v53 }
 0x65c   :  { %v943_v21 = vpop.xlane.xlu1 %942 }
 0x65d   :  { %v945_v63 = vsub.f32 %v935_v57, %v943_v21  ;;  %v1182_v57 = vld [vmem:[#allocation3 + $0x38] sm:$0xff] }
 0x65e   :  { %v940_v2 = vpop.xlane.xlu0 %939 }
 0x65f   :  { %v948_v26 = vmul.f32 1.442695, %v945_v63  ;;  %v944_v4 = vsub.f32 %v930_v59, %v940_v2  ;;  %v1180_v59 = vld [vmem:[#allocation3 + $0x8] sm:$0xff] }
 0x660   :  { %v961_v5 = vpop.permute.xlu1 %960 }
 0x661   :  { %1600 = vpow2.f32 %v948_v26  ;;  %v946_v7 = vmul.f32 1.442695, %v944_v4 }
 0x663   :  { %1602 = vpow2.f32 %v946_v7 }
 0x664   :  { %v628_v8 = vpop.permute.xlu1 %627 }
 0x665   :  { %634 = vst.msk [vmem:[#allocation2] sm:$0xff] %vm633_vm3, %v628_v8 }
 0x668   :  { %v630_v43 = vpop.permute.xlu1 %629 }
 0x669   :  { %635 = vst.msk [vmem:[#allocation2 + $0x8] sm:$0xff] %vm633_vm3, %v630_v43 }
 0x66c   :  { %v841_v10 = vpop.permute.xlu1 %840 }
 0x66d   :  { %846 = vst.msk [vmem:[#allocation2 + $0x8] sm:$0xff] %vm844_vm4, %v841_v10  ;;  %v1296_v10 = vld [vmem:[#allocation3 + $0xa0] sm:$0xff] }
 0x66e   :  { %v1601_v11 = vpop.eup %1600 }
 0x66f   :  { %v953_v12 = vsel %vm311_vm2, %v1601_v11, 0.0 }
 0x670   :  { %v1603_v13 = vpop.eup %1602  ;;  %954 = vadd.xlane.f32.xlu0 %v953_v12  ;;  %v1294_v12 = vld [vmem:[#allocation3 + $0x40] sm:$0xff] }
 0x671   :  { %v950_v14 = vsel %vm311_vm2, %v1603_v13, 0.0 }
 0x674   :  { %951 = vadd.xlane.f32.xlu0 %v950_v14  ;;  %v40_v14 = vld [vmem:[%s1927_s2] ss:$4 sm:$0x3] }
 0x68a   :  { %962 = vrot.lane.b32.xlu0 %v1766_v55, %s1674_s21  ;;  %v1063_v55 = vld [vmem:[#allocation3 + $0xb8] sm:$0xff] }
 0x68e   :  { %838 = vrot.lane.b32.xlu0 %v827_v54, %s1676_s23  ;;  %v1184_v54 = vld [vmem:[#allocation3 + $0x68] sm:$0xff] }
 0x68f   :  { %1230 = vmatprep.subr.mxu1 %v1184_v54 }
 0x690   :  { %1231 = vmatpush1.msra.mxu1 %v1183_v56 }
 0x691   :  { %1232 = vmatprep.subr.mxu1 %v1182_v57 }
 0x692   :  { %1233 = vmatpush1.msra.mxu1 %v1181_v58 }
 0x693   :  { %1234 = vmatprep.subr.mxu1 %v1180_v59 }
 0x694   :  { %1235 = vmatpush1.msra.mxu1 %v1179_v60 }
 0x6f9   :  { %v955_v15 = vpop.xlane.xlu0 %954 }
 0x6fa   :  { %1604 = vrcp.f32 %v955_v15 }
 0x6fd   :  { %v952_v16 = vpop.xlane.xlu0 %951 }
 0x6fe   :  { %1606 = vrcp.f32 %v952_v16 }
 0x701   :  { %v963_v17 = vpop.permute.xlu0 %962 }
 0x702   :  { %1523 = vmatprep.subr.mxu0 %v963_v17 }
 0x703   :  { %1524 = vmatpush3.msra.mxu0 %v963_v17 }
 0x704   :  { %1525 = vmatprep.subr.mxu0 %v961_v5 }
 0x705   :  { %1526 = vmatpush3.msra.mxu0 %v961_v5  ;;  %v839_v19 = vpop.permute.xlu0 %838 }
 0x706   :  { %845 = vst.msk [vmem:[#allocation2] sm:$0xff] %vm844_vm4, %v839_v19  ;;  %1530 = vmatprep.subr.mxu0 %v1063_v55 }
 0x707   :  { %v1605_v20 = vpop.eup %1604 }
 0x708   :  { %v959_v24 = vmul.f32 %v1605_v20, %v1601_v11  ;;  %v1295_v11 = vld [vmem:[#allocation3 + $0x70] sm:$0xff] }
 0x70b   :  { %v1607_v22 = vpop.eup %1606 }
 0x70c   :  { %v958_v23 = vmul.f32 %v1607_v22, %v1603_v13  ;;  %v1293_v13 = vld [vmem:[#allocation3 + $0x10] sm:$0xff] }
 0x70e   :  { %1527 = vmatprep.mubr.msk.f32.mxu0 %vm311_vm2, %v958_v23 }
 0x70f   :  { %1528 = vmatmul.mubr.msk.f32.vlgmr.msra.gmra.mxu0 %vm311_vm2, %v959_v24 }
 0x710   :  { %1531 = vmatpush3.msra.mxu0 %v1063_v55 }
 0x711   :  { %1532 = vmatprep.subr.mxu0 %v1062_v25 }
 0x712   :  { %1533 = vmatpush3.msra.mxu0 %v1062_v25  ;;  %v1191_v25 = vrot.slane %v40_v14, %v84_v39 }
 0x713   :  { %1534 = vmatprep.subr.mxu0 %v1061_v27 }
 0x714   :  { %1535 = vmatpush3.msra.mxu0 %v1061_v27 }
 0x715   :  { %1536 = vmatprep.subr.mxu0 %v1060_v28 }
 0x716   :  { %1537 = vmatpush3.msra.mxu0 %v1060_v28 }
 0x717   :  { %1541 = vmatprep.subr.mxu0 %v1296_v10 }
 0x7cf   :  { %v1529_v29 = vpop.f32.mrf.mxu0 }
 0x7d0   :  { %1051 = vrot.lane.b32.xlu1 %v1529_v29, %s1677_s24 }
 0x7d1   :  { %v1038_v30 = vpop.f32.mrf.mxu0 }
 0x7d2   :  { %1049 = vrot.lane.b32.xlu0 %v1038_v30, %s1677_s24 }
 0x842   :  { %v1052_v31 = vpop.permute.xlu1 %1051 }
 0x843   :  { %1057 = vst.msk [vmem:[#allocation2 + $0x8] sm:$0xff] %vm1055_vm5, %v1052_v31 }
 0x844   :  { %v1050_v6 = vpop.permute.xlu0 %1049 }
 0x845   :  { %1056 = vst.msk [vmem:[#allocation2] sm:$0xff] %vm1055_vm5, %v1050_v6 }
 0x84a   :  { %v1059_v32 = vld [vmem:[#allocation2 + $0x8] sm:$0xff] }
 0x84c   :  { %v1058_v9 = vld [vmem:[#allocation2] sm:$0xff] }
 0x84d   :  { %1538 = vmatprep.mubr.msk.f32.mxu0 %vm45_vm0, %v1058_v9 }
 0x84e   :  { %1539 = vmatmul.mubr.msk.f32.vlgmr.msra.gmra.mxu0 %vm45_vm0, %v1059_v32 }
 0x84f   :  { %1542 = vmatpush3.xpose.msra.mxu0 %v1296_v10 }
 0x850   :  { %1543 = vmatprep.subr.mxu0 %v1295_v11 }
 0x853   :  { %1544 = vmatpush3.xpose.msra.mxu0 %v1295_v11 }
 0x854   :  { %1545 = vmatprep.subr.mxu0 %v1294_v12 }
 0x857   :  { %1546 = vmatpush3.xpose.msra.mxu0 %v1294_v12 }
 0x858   :  { %1547 = vmatprep.subr.mxu0 %v1293_v13 }
 0x85b   :  { %1548 = vmatpush3.xpose.msra.mxu0 %v1293_v13 }
 0x90e   :  { %v1540_v33 = vpop.f32.mrf.mxu0 }
 0x90f   :  { %v1146_v61 = vadd.f32 %v1540_v33, %v1717_v1 }
 0x910   :  { %v1136_v34 = vpop.f32.mrf.mxu0 }
 0x911   :  { %v1891_v35 = vadd.f32 %v1426_v3, %v1146_v61  ;;  %v1145_v36 = vadd.f32 %v1136_v34, %v1712_v0  ;;  %v1429_v61 = vld [vmem:[%s1927_s2 + $0x3] ss:$0 sm:$0xff] }
 0x913   :  { %v1894_v37 = vadd.f32 %v1426_v3, %v1145_v36  ;;  %v1156_v40 = vsel %vm45_vm0, %v1891_v35, 0.0 }
 0x914   :  { %1157 = vadd.xlane.f32.xlu1 %v1156_v40 }
 0x915   :  { %v1153_v41 = vsel %vm45_vm0, %v1894_v37, 0.0 }
 0x916   :  { %1154 = vadd.xlane.f32.xlu0 %v1153_v41 }
 0x99d   :  { %v1158_v42 = vpop.xlane.xlu1 %1157 }
 0x99e   :  { %v1160_v45 = vmul.f32 0.03125, %v1158_v42 }
 0x99f   :  { %v1155_v46 = vpop.xlane.xlu0 %1154 }
 0x9a0   :  { %v1159_v47 = vmul.f32 0.03125, %v1155_v46  ;;  %v1162_v1 = vsub.f32 %v1891_v35, %v1160_v45 }
 0x9a2   :  { %v1161_v48 = vsub.f32 %v1894_v37, %v1159_v47  ;;  %v1164_v50 = vmul.f32 %v1162_v1, %v1162_v1 }
 0x9a4   :  { %v1163_v49 = vmul.f32 %v1161_v48, %v1161_v48  ;;  %v1168_v51 = vsel %vm45_vm0, %v1164_v50, 0.0 }
 0x9a6   :  { %v1165_v0 = vsel %vm45_vm0, %v1163_v49, 0.0 }
 0x9a7   :  { %1166 = vadd.xlane.f32.xlu0 %v1165_v0 }
 0x9ab   :  { %1169 = vadd.xlane.f32.xlu0 %v1168_v51 }
 0xa30   :  { %v1167_v62 = vpop.xlane.xlu0 %1166 }
 0xa31   :  { %v1171_v21 = vmul.f32 0.03125, %v1167_v62 }
 0xa33   :  { %v1173_v63 = vadd.f32 1e-05, %v1171_v21 }
 0xa34   :  { %v1170_v2 = vpop.xlane.xlu0 %1169 }
 0xa35   :  { %1608 = vrsqrt.f32 %v1173_v63  ;;  %v1172_v26 = vmul.f32 0.03125, %v1170_v2 }
 0xa37   :  { %v1174_v4 = vadd.f32 1e-05, %v1172_v26 }
 0xa39   :  { %1610 = vrsqrt.f32 %v1174_v4 }
 0xa42   :  { %v1609_v5 = vpop.eup %1608 }
 0xa43   :  { %v1177_v7 = vmul.f32 %v1609_v5, %v1161_v48 }
 0xa45   :  { %1427 = vmatmul.mubr.msk.f32.vlgmr.msra.gmra.mxu1 %vm45_vm0, %v1177_v7 }
 0xa46   :  { %v1611_v8 = vpop.eup %1610  ;;  %1274 = vmatprep.mubr.f32.mxu1 %v1663_v18  ;;  %v1195_v18 = vrot.slane %v40_v14, %v88_v44 }
 0xa47   :  { %v1178_v43 = vmul.f32 %v1611_v8, %v1162_v1 }
 0xa49   :  { %1428 = vmatmul.mubr.msk.f32.gmra.mxu1 %vm45_vm0, %v1178_v43 }
 0xb05   :  { %v1270_v15 = vpop.f32.mrf.mxu1 }
 0xb06   :  { %v1271_v30 = vadd.f32 %v1270_v15, %v1191_v25 }
 0xb07   :  { %v1272_v16 = vpop.f32.mrf.mxu1 }
 0xb08   :  { %v1273_v17 = vadd.f32 %v1272_v16, %v1195_v18 }
 0xb09   :  { %v1276_v19 = vpop.f32.mrf.mxu1 }
 0xb0a   :  { %v1281_v20 = vmul.f32 0.5, %v1273_v17  ;;  %v1277_v32 = vadd.f32 %v1276_v19, %v1191_v25 }
 0xb0b   :  { %v1278_v22 = vpop.f32.mrf.mxu1 }
 0xb0c   :  { %1612 = vtanh.f32 %v1281_v20  ;;  %v1279_v23 = vadd.f32 %v1278_v22, %v1195_v18 }
 0xb0e   :  { %v1282_v24 = vmul.f32 0.5, %v1279_v23 }
 0xb10   :  { %1614 = vtanh.f32 %v1282_v24 }
 0xb19   :  { %v1613_v55 = vpop.eup %1612 }
 0xb1a   :  { %v1285_v27 = vmul.f32 0.5, %v1613_v55 }
 0xb1c   :  { %v1287_v28 = vadd.f32 0.5, %v1285_v27 }
 0xb1d   :  { %v1615_v29 = vpop.eup %1614 }
 0xb1e   :  { %v1289_v31 = vmul.f32 %v1287_v28, %v1273_v17  ;;  %v1286_v44 = vmul.f32 0.5, %v1615_v29 }
 0xb20   :  { %v1288_v6 = vadd.f32 0.5, %v1286_v44  ;;  %v1291_v9 = vmul.f32 %v1289_v31, %v1271_v30 }
 0xb22   :  { %v1290_v3 = vmul.f32 %v1288_v6, %v1279_v23  ;;  %1549 = vmatprep.mubr.f32.mxu0 %v1291_v9 }
 0xb24   :  { %v1292_v33 = vmul.f32 %v1290_v3, %v1277_v32 }
 0xb26   :  { %1550 = vmatmul.mubr.f32.vlgmr.msra.gmra.mxu0 %v1292_v33 }
 0xbe6   :  { %v1551_v34 = vpop.f32.mrf.mxu0 }
 0xbe7   :  { %v1373_v38 = vadd.f32 %v1551_v34, %v1429_v61 }
 0xbe8   :  { %v1367_v39 = vpop.f32.mrf.mxu0 }
 0xbe9   :  { %v1377_v36 = vadd.f32 %v1373_v38, %v1891_v35  ;;  %v1368_v40 = vadd.f32 %v1429_v61, %v1367_v39 }
 0xbeb   :  { %1379 = vst.msk [vmem:[#allocation6 + $0x8] sm:$0xff] %vm45_vm0, %v1377_v36  ;;  %v1376_v41 = vadd.f32 %v1368_v40, %v1894_v37 }
 0xbed   :  { %1378 = vst.msk [vmem:[#allocation6] sm:$0xff] %vm45_vm0, %v1376_v41 }
 0xbee   :  { %1647 = shalt.err (!%p1644_p9)
}
 0xbef   :  { %s1679_s2 = smov 128  }
 0xbf0   :  { %1391 = dma.vmem_to_hbm [thread:$0]  %s1386_s30, 256, %s1929_s4, [#allocation5], %s1679_s2, %s1679_s2, %s1675_s22  }
 0xbf1   :  { %1658 = dma.done.wait [#allocation5], 256  }
 0xbf2   :  { %1659 = vsyncadd [#allocation5], 4294967040 }
 0xbf3   :  { %1395 = vsyncpa [#allocation4], 1 }
 0xbf4   :  { %1396 = vsyncpa [#allocation5], 1 }

</bundles_post_ra>
